<compile_context>
chip_gen: v7x
topology: tpu7x:2x2x1
jax: 0.10.0
libtpu: 0.0.40
codegen_flags: <defaults>
</compile_context>

<pallas_src>
import functools

import jax
import jax.numpy as jnp
from jax.experimental import pallas as pl
from jax.experimental.pallas import tpu as pltpu


def _round_up(a, b):
    return ((a + b - 1) // b) * b


def _dice_sums_kernel(x_ref, t_ref, o_ref, *, n_cls, tile_rows,
                      tiles_per_split, hw, apply_softmax, needs_mask):
    """Accumulate per-class, per-(sublane,lane) partial sums.

    x_ref : (1, C, TR, 128)  scores (any float dtype; cast to f32 here)
    t_ref : (1, 1, TR, 128)  int32 class labels
    o_ref : (1, 3, C, 8, 128) f32  running [intersect, z_sum, y_sum] partials
    """
    s = pl.program_id(0)      # split (parallel on v7x)
    n = pl.program_id(1)      # sample
    tt = pl.program_id(2)     # pixel-row tile within this split

    @pl.when((n == 0) & (tt == 0))
    def _init():
        o_ref[...] = jnp.zeros_like(o_ref)

    x = x_ref[0].astype(jnp.float32)       # (C, TR, 128)
    t = t_ref[0, 0]                        # (TR, 128) int32

    if apply_softmax:
        # Softmax over the class axis, fused (exp on EUP, cheap per-class adds).
        m = x[0]
        for ci in range(1, n_cls):
            m = jnp.maximum(m, x[ci])
        e = jnp.exp(x - m)
        d = e[0]
        for ci in range(1, n_cls):
            d = d + e[ci]
        x = e * (1.0 / d)

    if needs_mask:
        # Per-pixel validity: covers explicit padding, ragged edge blocks and
        # clamped duplicate tiles (their flat pixel index is always >= hw).
        rows = jax.lax.broadcasted_iota(jnp.int32, (tile_rows, 128), 0)
        lanes = jax.lax.broadcasted_iota(jnp.int32, (tile_rows, 128), 1)
        row0 = (s * tiles_per_split + tt) * tile_rows
        pix = (row0 + rows) * 128 + lanes
        valid = pix < hw                                  # (TR, 128) bool
        x = jnp.where(valid, x, 0.0)
        oh = jnp.stack([(t == ci) & valid for ci in range(n_cls)], axis=0)
    else:
        oh = jnp.stack([t == ci for ci in range(n_cls)], axis=0)
    oh = oh.astype(jnp.float32)                           # (C, TR, 128)

    def _fold8(v):
        # (C, TR, 128) -> (C, 8, 128): sum groups of 8 sublanes (pure VALU adds
        # of tile-aligned slices; no cross-lane work in the hot loop).
        out = v[:, 0:8, :]
        for j in range(1, tile_rows // 8):
            out = out + v[:, j * 8:(j + 1) * 8, :]
        return out

    o_ref[0, 0] += _fold8(x * oh)     # intersect partials
    o_ref[0, 1] += _fold8(x * x)      # z_sum partials
    o_ref[0, 2] += _fold8(oh)         # y_sum partials (onehot^2 == onehot)


@functools.partial(jax.jit,
                   static_argnames=("n_classes", "softmax", "tile_p",
                                    "num_splits"))
def dice_loss(inputs, target, *, n_classes, weight=None, softmax=False,
              tile_p=32768, num_splits=2):
    """Equivalent of DiceLoss(n_classes).forward(inputs, target, weight, softmax)."""
    n, c, h, w = inputs.shape
    assert c == n_classes, f"predict C={c} & n_classes={n_classes} do not match"
    assert target.shape == (n, h, w)

    hw = h * w
    # Pad flattened pixels to a multiple of 8*128 so the row axis is a
    # multiple of 8 (no pad at all for typical segmentation sizes).
    hw_pad = _round_up(hw, 8 * 128)
    x = inputs.reshape(n, c, hw)                       # free reshape, no transpose
    t = target.astype(jnp.int32).reshape(n, 1, hw)
    if hw_pad != hw:
        x = jnp.pad(x, ((0, 0), (0, 0), (0, hw_pad - hw)))
        t = jnp.pad(t, ((0, 0), (0, 0), (0, hw_pad - hw)))
    rows_total = hw_pad // 128                         # multiple of 8
    x = x.reshape(n, c, rows_total, 128)
    t = t.reshape(n, 1, rows_total, 128)

    tile_p = max(1024, _round_up(tile_p, 1024))
    tile_rows = min(tile_p // 128, rows_total)          # multiple of 8
    n_row_tiles = pl.cdiv(rows_total, tile_rows)
    splits = num_splits if n_row_tiles >= num_splits else 1
    splits = max(1, splits)
    tiles_per_split = pl.cdiv(n_row_tiles, splits)

    needs_mask = (hw_pad != hw) or (rows_total % tile_rows != 0) \
        or (splits * tiles_per_split != n_row_tiles)

    kernel = functools.partial(
        _dice_sums_kernel,
        n_cls=c, tile_rows=tile_rows, tiles_per_split=tiles_per_split,
        hw=hw, apply_softmax=bool(softmax), needs_mask=needs_mask)

    def _row_block(s, nn, tt):
        # Clamp so duplicate (masked-out) tiles never index out of range.
        return jnp.minimum(s * tiles_per_split + tt, n_row_tiles - 1)

    raw = pl.pallas_call(
        kernel,
        out_shape=jax.ShapeDtypeStruct((splits, 3, c, 8, 128), jnp.float32),
        grid_spec=pltpu.PrefetchScalarGridSpec(
            num_scalar_prefetch=0,
            grid=(splits, n, tiles_per_split),
            in_specs=[
                pl.BlockSpec((1, c, tile_rows, 128),
                             lambda s, nn, tt: (nn, 0, _row_block(s, nn, tt), 0)),
                pl.BlockSpec((1, 1, tile_rows, 128),
                             lambda s, nn, tt: (nn, 0, _row_block(s, nn, tt), 0)),
            ],
            out_specs=pl.BlockSpec((1, 3, c, 8, 128),
                                   lambda s, nn, tt: (s, 0, 0, 0, 0)),
        ),
        compiler_params=pltpu.CompilerParams(
            dimension_semantics=("parallel", "arbitrary", "arbitrary")),
    )(x, t)

    # Tiny final reductions + combine stay in plain JAX.
    sums = jnp.sum(raw, axis=(0, 3, 4))                # (3, C)
    intersect, z_sum, y_sum = sums[0], sums[1], sums[2]
    smooth = 1e-5
    dice = 1.0 - (2.0 * intersect + smooth) / (z_sum + y_sum + smooth)

    if weight is None:
        weight = jnp.ones((n_classes,), jnp.float32)
    else:
        weight = jnp.asarray(weight, jnp.float32)
    return jnp.sum(dice * weight) / n_classes


def _dice_loss_ref(inputs, target, n_classes, weight=None, softmax=False):
    """Pure-JAX reference matching the PyTorch module."""
    if softmax:
        inputs = jax.nn.softmax(inputs, axis=1)
    smooth = 1e-5
    if weight is None:
        weight = [1.0] * n_classes
    loss = 0.0
    for i in range(n_classes):
        score = inputs[:, i].astype(jnp.float32)
        tgt = (target == i).astype(jnp.float32)
        intersect = jnp.sum(score * tgt)
        y_sum = jnp.sum(tgt * tgt)
        z_sum = jnp.sum(score * score)
        dice = 1.0 - (2.0 * intersect + smooth) / (z_sum + y_sum + smooth)
        loss = loss + dice * weight[i]
    return loss / n_classes


if __name__ == "__main__":
    key = jax.random.PRNGKey(0)
    k1, k2 = jax.random.split(key)

    n_classes = 4
    # inputs: (N, C, H, W) = (2, 4, 16, 16); target: (N, H, W) integer labels
    logits = jax.random.normal(k1, (2, n_classes, 16, 16), dtype=jnp.float32)
    target = jax.random.randint(k2, (2, 16, 16), 0, n_classes, dtype=jnp.int32)

    # softmax=True path (softmax fused into the kernel).
    out = dice_loss(logits, target, n_classes=n_classes, softmax=True)
    out = jax.block_until_ready(out)
    ref = _dice_loss_ref(logits, target, n_classes, softmax=True)
    assert jnp.allclose(out, ref, rtol=1e-4, atol=1e-6), (out, ref)

    # softmax=False path with class weights.
    probs = jax.nn.softmax(logits, axis=1)
    wvec = [0.5, 1.0, 1.5, 2.0]
    out2 = dice_loss(probs, target, n_classes=n_classes,
                     weight=jnp.asarray(wvec, jnp.float32), softmax=False)
    out2 = jax.block_until_ready(out2)
    ref2 = _dice_loss_ref(probs, target, n_classes, weight=wvec, softmax=False)
    assert jnp.allclose(out2, ref2, rtol=1e-4, atol=1e-6), (out2, ref2)

    print("KERNEL_OK")
</pallas_src>

<mosaic_0001>
module attributes {stable_mosaic.version = 11 : i64} {
  func.func @_dice_sums_kernel(%arg0: i32, %arg1: i32, %arg2: i32, %arg3: memref<1x4x8x128xf32, #tpu.memory_space<vmem>>, %arg4: memref<1x1x8x128xi32, #tpu.memory_space<vmem>>, %arg5: memref<1x3x4x8x128xf32, #tpu.memory_space<vmem>>) attributes {dimension_semantics = [#tpu.dimension_semantics<parallel>, #tpu.dimension_semantics<arbitrary>, #tpu.dimension_semantics<arbitrary>], iteration_bounds = array<i64: 1, 2, 1>, scalar_prefetch = 0 : i64, scratch_operands = 0 : i64, tpu.core_type = #tpu.core_type<tc>, window_params = [{transform_indices = @transform_0, window_bounds = array<i64: 1, 4, 8, 128>}, {transform_indices = @transform_1, window_bounds = array<i64: 1, 1, 8, 128>}, {transform_indices = @transform_2, window_bounds = array<i64: 1, 3, 4, 8, 128>}]} {
    %c0_i32 = arith.constant 0 : i32
    %0 = arith.cmpi eq, %arg1, %c0_i32 : i32
    %c0_i32_0 = arith.constant 0 : i32
    %1 = arith.cmpi eq, %arg2, %c0_i32_0 : i32
    %2 = arith.andi %0, %1 : i1
    %3 = arith.extui %2 : i1 to i32
    %c0_i32_1 = arith.constant 0 : i32
    %4 = arith.cmpi ne, %3, %c0_i32_1 : i32
    scf.if %4 {
      %cst_40 = arith.constant 0.000000e+00 : f32
      %95 = vector.broadcast %cst_40 : f32 to vector<1x3x4x8x128xf32>
      %c0_41 = arith.constant 0 : index
      %c0_42 = arith.constant 0 : index
      %c0_43 = arith.constant 0 : index
      %c0_44 = arith.constant 0 : index
      %c0_45 = arith.constant 0 : index
      %96 = vector.load %arg5[%c0_41, %c0_42, %c0_43, %c0_44, %c0_45] : memref<1x3x4x8x128xf32, #tpu.memory_space<vmem>>, vector<1x3x4x8x128xf32>
      tpu.vector_store %arg5[%c0_41, %c0_42, %c0_43, %c0_44, %c0_45], %95 {strides = array<i32>} : memref<1x3x4x8x128xf32, #tpu.memory_space<vmem>>, vector<1x3x4x8x128xf32>,
    } else {
    }
    %c0 = arith.constant 0 : index
    %c0_2 = arith.constant 0 : index
    %c0_3 = arith.constant 0 : index
    %c0_4 = arith.constant 0 : index
    %5 = vector.load %arg3[%c0, %c0_2, %c0_3, %c0_4] : memref<1x4x8x128xf32, #tpu.memory_space<vmem>>, vector<1x4x8x128xf32>
    %6 = vector.shape_cast %5 : vector<1x4x8x128xf32> to vector<4x8x128xf32>
    %c0_5 = arith.constant 0 : index
    %c0_6 = arith.constant 0 : index
    %c0_7 = arith.constant 0 : index
    %c0_8 = arith.constant 0 : index
    %7 = vector.load %arg4[%c0_5, %c0_6, %c0_7, %c0_8] : memref<1x1x8x128xi32, #tpu.memory_space<vmem>>, vector<1x1x8x128xi32>
    %8 = vector.shape_cast %7 : vector<1x1x8x128xi32> to vector<8x128xi32>
    %9 = vector.extract_strided_slice %6 {offsets = [0, 0, 0], sizes = [1, 8, 128], strides = [1, 1, 1]} : vector<4x8x128xf32> to vector<1x8x128xf32>
    %10 = vector.shape_cast %9 : vector<1x8x128xf32> to vector<8x128xf32>
    %11 = vector.extract_strided_slice %6 {offsets = [1, 0, 0], sizes = [1, 8, 128], strides = [1, 1, 1]} : vector<4x8x128xf32> to vector<1x8x128xf32>
    %12 = vector.shape_cast %11 : vector<1x8x128xf32> to vector<8x128xf32>
    %13 = arith.maximumf %10, %12 : vector<8x128xf32>
    %14 = vector.extract_strided_slice %6 {offsets = [2, 0, 0], sizes = [1, 8, 128], strides = [1, 1, 1]} : vector<4x8x128xf32> to vector<1x8x128xf32>
    %15 = vector.shape_cast %14 : vector<1x8x128xf32> to vector<8x128xf32>
    %16 = arith.maximumf %13, %15 : vector<8x128xf32>
    %17 = vector.extract_strided_slice %6 {offsets = [3, 0, 0], sizes = [1, 8, 128], strides = [1, 1, 1]} : vector<4x8x128xf32> to vector<1x8x128xf32>
    %18 = vector.shape_cast %17 : vector<1x8x128xf32> to vector<8x128xf32>
    %19 = arith.maximumf %16, %18 : vector<8x128xf32>
    %20 = vector.shape_cast %19 : vector<8x128xf32> to vector<1x8x128xf32>
    %21 = vector.broadcast %20 : vector<1x8x128xf32> to vector<4x8x128xf32>
    %22 = arith.subf %6, %21 : vector<4x8x128xf32>
    %23 = math.exp %22 : vector<4x8x128xf32>
    %24 = vector.extract_strided_slice %23 {offsets = [0, 0, 0], sizes = [1, 8, 128], strides = [1, 1, 1]} : vector<4x8x128xf32> to vector<1x8x128xf32>
    %25 = vector.shape_cast %24 : vector<1x8x128xf32> to vector<8x128xf32>
    %26 = vector.extract_strided_slice %23 {offsets = [1, 0, 0], sizes = [1, 8, 128], strides = [1, 1, 1]} : vector<4x8x128xf32> to vector<1x8x128xf32>
    %27 = vector.shape_cast %26 : vector<1x8x128xf32> to vector<8x128xf32>
    %28 = arith.addf %25, %27 : vector<8x128xf32>
    %29 = vector.extract_strided_slice %23 {offsets = [2, 0, 0], sizes = [1, 8, 128], strides = [1, 1, 1]} : vector<4x8x128xf32> to vector<1x8x128xf32>
    %30 = vector.shape_cast %29 : vector<1x8x128xf32> to vector<8x128xf32>
    %31 = arith.addf %28, %30 : vector<8x128xf32>
    %32 = vector.extract_strided_slice %23 {offsets = [3, 0, 0], sizes = [1, 8, 128], strides = [1, 1, 1]} : vector<4x8x128xf32> to vector<1x8x128xf32>
    %33 = vector.shape_cast %32 : vector<1x8x128xf32> to vector<8x128xf32>
    %34 = arith.addf %31, %33 : vector<8x128xf32>
    %cst = arith.constant 1.000000e+00 : f32
    %35 = vector.broadcast %cst : f32 to vector<8x128xf32>
    %36 = arith.divf %35, %34 : vector<8x128xf32>
    %37 = vector.shape_cast %36 : vector<8x128xf32> to vector<1x8x128xf32>
    %38 = vector.broadcast %37 : vector<1x8x128xf32> to vector<4x8x128xf32>
    %39 = arith.mulf %23, %38 : vector<4x8x128xf32>
    %40 = tpu.iota {dimensions = array<i32: 0>} : vector<8x128xi32>
    %41 = tpu.iota {dimensions = array<i32: 1>} : vector<8x128xi32>
    %c1_i32 = arith.constant 1 : i32
    %42 = arith.muli %arg0, %c1_i32 : i32
    %43 = arith.addi %42, %arg2 : i32
    %c8_i32 = arith.constant 8 : i32
    %44 = arith.muli %43, %c8_i32 : i32
    %45 = vector.broadcast %44 : i32 to vector<8x128xi32>
    %46 = arith.addi %45, %40 : vector<8x128xi32>
    %c128_i32 = arith.constant 128 : i32
    %47 = vector.broadcast %c128_i32 : i32 to vector<8x128xi32>
    %48 = arith.muli %46, %47 : vector<8x128xi32>
    %49 = arith.addi %48, %41 : vector<8x128xi32>
    %c256_i32 = arith.constant 256 : i32
    %50 = vector.broadcast %c256_i32 : i32 to vector<8x128xi32>
    %51 = arith.cmpi slt, %49, %50 : vector<8x128xi32>
    %cst_9 = arith.constant 0.000000e+00 : f32
    %52 = vector.shape_cast %51 : vector<8x128xi1> to vector<1x8x128xi1>
    %53 = vector.broadcast %52 : vector<1x8x128xi1> to vector<4x8x128xi1>
    %54 = vector.broadcast %cst_9 : f32 to vector<4x8x128xf32>
    %55 = arith.select %53, %39, %54 : vector<4x8x128xi1>, vector<4x8x128xf32>
    %c0_i32_10 = arith.constant 0 : i32
    %56 = vector.broadcast %c0_i32_10 : i32 to vector<8x128xi32>
    %57 = arith.cmpi eq, %8, %56 : vector<8x128xi32>
    %58 = arith.andi %57, %51 : vector<8x128xi1>
    %c1_i32_11 = arith.constant 1 : i32
    %59 = vector.broadcast %c1_i32_11 : i32 to vector<8x128xi32>
    %60 = arith.cmpi eq, %8, %59 : vector<8x128xi32>
    %61 = arith.andi %60, %51 : vector<8x128xi1>
    %c2_i32 = arith.constant 2 : i32
    %62 = vector.broadcast %c2_i32 : i32 to vector<8x128xi32>
    %63 = arith.cmpi eq, %8, %62 : vector<8x128xi32>
    %64 = arith.andi %63, %51 : vector<8x128xi1>
    %c3_i32 = arith.constant 3 : i32
    %65 = vector.broadcast %c3_i32 : i32 to vector<8x128xi32>
    %66 = arith.cmpi eq, %8, %65 : vector<8x128xi32>
    %67 = arith.andi %66, %51 : vector<8x128xi1>
    %68 = vector.shape_cast %58 : vector<8x128xi1> to vector<1x8x128xi1>
    %69 = vector.shape_cast %61 : vector<8x128xi1> to vector<1x8x128xi1>
    %70 = vector.shape_cast %64 : vector<8x128xi1> to vector<1x8x128xi1>
    %71 = vector.shape_cast %67 : vector<8x128xi1> to vector<1x8x128xi1>
    %72 = tpu.concatenate %68, %69, %70, %71 in 0 : vector<1x8x128xi1>, vector<1x8x128xi1>, vector<1x8x128xi1>, vector<1x8x128xi1> -> vector<4x8x128xi1>
    %73 = arith.extui %72 : vector<4x8x128xi1> to vector<4x8x128xi32>
    %74 = arith.sitofp %73 : vector<4x8x128xi32> to vector<4x8x128xf32>
    %c0_12 = arith.constant 0 : index
    %c0_13 = arith.constant 0 : index
    %c0_14 = arith.constant 0 : index
    %c0_15 = arith.constant 0 : index
    %c0_16 = arith.constant 0 : index
    %75 = vector.load %arg5[%c0_12, %c0_13, %c0_14, %c0_15, %c0_16] : memref<1x3x4x8x128xf32, #tpu.memory_space<vmem>>, vector<1x1x4x8x128xf32>
    %76 = vector.shape_cast %75 : vector<1x1x4x8x128xf32> to vector<4x8x128xf32>
    %77 = arith.mulf %55, %74 : vector<4x8x128xf32>
    %78 = arith.addf %76, %77 : vector<4x8x128xf32>
    %c0_17 = arith.constant 0 : index
    %c0_18 = arith.constant 0 : index
    %c0_19 = arith.constant 0 : index
    %c0_20 = arith.constant 0 : index
    %c0_21 = arith.constant 0 : index
    %79 = vector.load %arg5[%c0_17, %c0_18, %c0_19, %c0_20, %c0_21] : memref<1x3x4x8x128xf32, #tpu.memory_space<vmem>>, vector<1x1x4x8x128xf32>
    %80 = vector.shape_cast %79 : vector<1x1x4x8x128xf32> to vector<4x8x128xf32>
    %81 = vector.shape_cast %78 : vector<4x8x128xf32> to vector<1x1x4x8x128xf32>
    tpu.vector_store %arg5[%c0_17, %c0_18, %c0_19, %c0_20, %c0_21], %81 {strides = array<i32>} : memref<1x3x4x8x128xf32, #tpu.memory_space<vmem>>, vector<1x1x4x8x128xf32>,
    %c0_22 = arith.constant 0 : index
    %c1 = arith.constant 1 : index
    %c0_23 = arith.constant 0 : index
    %c0_24 = arith.constant 0 : index
    %c0_25 = arith.constant 0 : index
    %82 = vector.load %arg5[%c0_22, %c1, %c0_23, %c0_24, %c0_25] : memref<1x3x4x8x128xf32, #tpu.memory_space<vmem>>, vector<1x1x4x8x128xf32>
    %83 = vector.shape_cast %82 : vector<1x1x4x8x128xf32> to vector<4x8x128xf32>
    %84 = arith.mulf %55, %55 : vector<4x8x128xf32>
    %85 = arith.addf %83, %84 : vector<4x8x128xf32>
    %c0_26 = arith.constant 0 : index
    %c1_27 = arith.constant 1 : index
    %c0_28 = arith.constant 0 : index
    %c0_29 = arith.constant 0 : index
    %c0_30 = arith.constant 0 : index
    %86 = vector.load %arg5[%c0_26, %c1_27, %c0_28, %c0_29, %c0_30] : memref<1x3x4x8x128xf32, #tpu.memory_space<vmem>>, vector<1x1x4x8x128xf32>
    %87 = vector.shape_cast %86 : vector<1x1x4x8x128xf32> to vector<4x8x128xf32>
    %88 = vector.shape_cast %85 : vector<4x8x128xf32> to vector<1x1x4x8x128xf32>
    tpu.vector_store %arg5[%c0_26, %c1_27, %c0_28, %c0_29, %c0_30], %88 {strides = array<i32>} : memref<1x3x4x8x128xf32, #tpu.memory_space<vmem>>, vector<1x1x4x8x128xf32>,
    %c0_31 = arith.constant 0 : index
    %c2 = arith.constant 2 : index
    %c0_32 = arith.constant 0 : index
    %c0_33 = arith.constant 0 : index
    %c0_34 = arith.constant 0 : index
    %89 = vector.load %arg5[%c0_31, %c2, %c0_32, %c0_33, %c0_34] : memref<1x3x4x8x128xf32, #tpu.memory_space<vmem>>, vector<1x1x4x8x128xf32>
    %90 = vector.shape_cast %89 : vector<1x1x4x8x128xf32> to vector<4x8x128xf32>
    %91 = arith.addf %90, %74 : vector<4x8x128xf32>
    %c0_35 = arith.constant 0 : index
    %c2_36 = arith.constant 2 : index
    %c0_37 = arith.constant 0 : index
    %c0_38 = arith.constant 0 : index
    %c0_39 = arith.constant 0 : index
    %92 = vector.load %arg5[%c0_35, %c2_36, %c0_37, %c0_38, %c0_39] : memref<1x3x4x8x128xf32, #tpu.memory_space<vmem>>, vector<1x1x4x8x128xf32>
    %93 = vector.shape_cast %92 : vector<1x1x4x8x128xf32> to vector<4x8x128xf32>
    %94 = vector.shape_cast %91 : vector<4x8x128xf32> to vector<1x1x4x8x128xf32>
    tpu.vector_store %arg5[%c0_35, %c2_36, %c0_37, %c0_38, %c0_39], %94 {strides = array<i32>} : memref<1x3x4x8x128xf32, #tpu.memory_space<vmem>>, vector<1x1x4x8x128xf32>,
    return
  }
  func.func @transform_0(%arg0: i32, %arg1: i32, %arg2: i32) -> (i32, i32, i32, i32) {
    %c1_i32 = arith.constant 1 : i32
    %0 = arith.muli %arg0, %c1_i32 : i32
    %1 = arith.addi %0, %arg2 : i32
    %c0_i32 = arith.constant 0 : i32
    %2 = arith.minsi %1, %c0_i32 : i32
    %c0_i32_0 = arith.constant 0 : i32
    %c0_i32_1 = arith.constant 0 : i32
    %c0_i32_2 = arith.constant 0 : i32
    return %arg1, %c0_i32_0, %2, %c0_i32_1 : i32, i32, i32, i32
  }
  func.func @transform_1(%arg0: i32, %arg1: i32, %arg2: i32) -> (i32, i32, i32, i32) {
    %c1_i32 = arith.constant 1 : i32
    %0 = arith.muli %arg0, %c1_i32 : i32
    %1 = arith.addi %0, %arg2 : i32
    %c0_i32 = arith.constant 0 : i32
    %2 = arith.minsi %1, %c0_i32 : i32
    %c0_i32_0 = arith.constant 0 : i32
    %c0_i32_1 = arith.constant 0 : i32
    %c0_i32_2 = arith.constant 0 : i32
    return %arg1, %c0_i32_0, %2, %c0_i32_1 : i32, i32, i32, i32
  }
  func.func @transform_2(%arg0: i32, %arg1: i32, %arg2: i32) -> (i32, i32, i32, i32, i32) {
    %c0_i32 = arith.constant 0 : i32
    %c0_i32_0 = arith.constant 0 : i32
    %c0_i32_1 = arith.constant 0 : i32
    %c0_i32_2 = arith.constant 0 : i32
    %c0_i32_3 = arith.constant 0 : i32
    return %arg0, %c0_i32, %c0_i32_0, %c0_i32_1, %c0_i32_2 : i32, i32, i32, i32, i32
  }
}

</mosaic_0001>

<bundles_post_ra>
// kernel: dice_loss.1
= control target key start
LH: loop header
LB: loop body
LE: loop exit
PB: predicated region body
PF: predicated region fallthrough
CT: control target
= control target key end

     0   :  { %s565_s9 = smov 0   ;;  %s567_s10 = smov 0   ;;  %s717_s0 = inlined_call_operand.vmem [shape: f32[2,4,8,128], index: 0, kind: input, shape index: {}]   ;;  %s718_s1 = inlined_call_operand.vmem [shape: s32[2,1,8,128], index: 1, kind: input, shape index: {}]   ;;  %s719_s2 = inlined_call_operand.vmem [shape: f32[1,3,4,8,128], index: 2, kind: output, shape index: {}]  }
   0x1   :  { %s569_s11 = smov 0  }
   0x2 LB: > { %s27_s12 = sadd.s32 1, %s542_s10  ;;  %p458_p0 = scmp.ge.s32.totalorder %s546_s11, 1  ;;  %s546_s11 = sphi %s569_s11, %s12_s11   ;;  %s542_s10 = sphi %s567_s10, %s721_s10   ;;  %s538_s9 = sphi %s565_s9, %s720_s9  }
   0x3   : > { %p29_p1 = scmp.ge.s32.totalorder %s27_s12, 2  ;;  %p174_p2 = scmp.lt.s32.totalorder %s546_s11, 3 }
   0x5   : > { %s723_s12 = smov (%p29_p1, %s27_s12), 0  ;;  %p175_p3 = pnand %p458_p0, %p174_p2 }
   0x6   : > { %p215_p4 = scmp.lt.s32.totalorder (!%p175_p3), %s538_s9, 1  ;;  %p244_p5 = scmp.eq.s32.totalorder (!%p175_p3), %s538_s9, 0 }
   0x7   : > { %178 = sbr.rel (%p175_p3) target bundleno = 73 (0x49), region = 28 }
   0xe   : > { %s725_s9 = smov (!%p215_p4, %s538_s9), 1  ;;  %249 = sbr.rel (!%p244_p5) target bundleno = 22 (0x16), region = 32 }
   0xf   : > { %s486_s13 = sshll.u32 %s725_s9, 5  ;;  %s461_s14 = sshll.u32 %s725_s9, 3  ;;  %v548_v0 = vmov (%p244_p5), 0.0  }
  0x10   : > { %s222_s17 = scalar_lea.vmem %s717_s0, %s486_s13  ;;  %s235_s20 = scalar_lea.vmem %s718_s1, %s461_s14  ;;  %250 = vst [vmem:[%s719_s2] sm:$0xff] (%p244_p5), %v548_v0  ;;  %251 = vst [vmem:[%s719_s2 + $0x8] sm:$0xff] (%p244_p5), %v548_v0 }
  0x11   : > { %252 = vst [vmem:[%s719_s2 + $0x10] sm:$0xff] (%p244_p5), %v548_v0  ;;  %253 = vst [vmem:[%s719_s2 + $0x18] sm:$0xff] (%p244_p5), %v548_v0 }
  0x12   : > { %254 = vst [vmem:[%s719_s2 + $0x20] sm:$0xff] (%p244_p5), %v548_v0  ;;  %255 = vst [vmem:[%s719_s2 + $0x28] sm:$0xff] (%p244_p5), %v548_v0 }
  0x13   : > { %256 = vst [vmem:[%s719_s2 + $0x30] sm:$0xff] (%p244_p5), %v548_v0  ;;  %257 = vst [vmem:[%s719_s2 + $0x38] sm:$0xff] (%p244_p5), %v548_v0 }
  0x14   : > { %258 = vst [vmem:[%s719_s2 + $0x40] sm:$0xff] (%p244_p5), %v548_v0  ;;  %259 = vst [vmem:[%s719_s2 + $0x48] sm:$0xff] (%p244_p5), %v548_v0 }
  0x15   : > { %260 = vst [vmem:[%s719_s2 + $0x50] sm:$0xff] %v548_v0  ;;  %261 = vst [vmem:[%s719_s2 + $0x58] sm:$0xff] %v548_v0 }
  0x16 PF: > { %v262_v1 = vld [vmem:[%s222_s17] sm:$0xff]  ;;  %v263_v2 = vld [vmem:[%s222_s17 + $0x8] sm:$0xff]  ;;  %v264_v3 = vld [vmem:[%s222_s17 + $0x10] sm:$0xff]  ;;  %v291_v4 = vlaneseq  ;;  %v549_v24 = vmov 0.0  }
  0x17   : > { %v267_v5 = vmax.f32 %v262_v1, %v263_v2  ;;  %v265_v6 = vld [vmem:[%s222_s17 + $0x18] sm:$0xff]  ;;  %v266_v9 = vld [vmem:[%s235_s20] sm:$0xff] }
  0x18   : > { %v292_v7 = vshrl.u32 %v291_v4, 7  ;;  %v294_v8 = vand.u32 127, %v291_v4  ;;  %vm308_vm0 = vcmp.eq.s32.totalorder %v266_v9, 0  ;;  %vm310_vm1 = vcmp.eq.s32.totalorder %v266_v9, 1  ;;  %v324_v47 = vld [vmem:[%s719_s2] sm:$0xff]  ;;  %v325_v48 = vld [vmem:[%s719_s2 + $0x8] sm:$0xff] }
  0x19   : > { %v268_v10 = vmax.f32 %v267_v5, %v264_v3  ;;  %vm312_vm3 = vcmp.eq.s32.totalorder %v266_v9, 2  ;;  %vm314_vm4 = vcmp.eq.s32.totalorder %v266_v9, 3  ;;  %v326_v49 = vld [vmem:[%s719_s2 + $0x10] sm:$0xff]  ;;  %v327_v54 = vld [vmem:[%s719_s2 + $0x18] sm:$0xff] }
  0x1a   : > { %v299_v11 = vmul.u32 128, %v292_v7  ;;  %v467_v55 = vld [vmem:[%s719_s2 + $0x20] sm:$0xff]  ;;  %v468_v60 = vld [vmem:[%s719_s2 + $0x28] sm:$0xff] }
  0x1b   : > { %v269_v12 = vmax.f32 %v268_v10, %v265_v6  ;;  %v469_v61 = vld [vmem:[%s719_s2 + $0x30] sm:$0xff]  ;;  %v470_v62 = vld [vmem:[%s719_s2 + $0x38] sm:$0xff] }
  0x1c   : > { %v300_v13 = vadd.s32 %v299_v11, %v294_v8  ;;  %v475_v18 = vld [vmem:[%s719_s2 + $0x40] sm:$0xff]  ;;  %v476_v19 = vld [vmem:[%s719_s2 + $0x48] sm:$0xff]  ;;  %v477_v26 = vld [vmem:[%s719_s2 + $0x50] sm:$0xff] }
  0x1d   : > { %v270_v14 = vsub.f32 %v262_v1, %v269_v12  ;;  %v271_v15 = vsub.f32 %v263_v2, %v269_v12  ;;  %v272_v16 = vsub.f32 %v264_v3, %v269_v12  ;;  %v273_v17 = vsub.f32 %v265_v6, %v269_v12  ;;  %v478_v29 = vld [vmem:[%s719_s2 + $0x58] sm:$0xff] }
  0x1e   : > { %vm301_vm2 = vcmp.lt.s32.totalorder %v300_v13, 256 }
  0x1f   : > { %v274_v20 = vmul.f32 1.442695, %v270_v14  ;;  %v276_v21 = vmul.f32 1.442695, %v271_v15  ;;  %v278_v22 = vmul.f32 1.442695, %v272_v16  ;;  %vm309_vm5 = vmand %vm308_vm0, %vm301_vm2 }
  0x20   : > { %v280_v23 = vmul.f32 1.442695, %v273_v17  ;;  %v463_v25 = vsel %vm309_vm5, 1.0, %v549_v24  ;;  %vm311_vm6 = vmand %vm310_vm1, %vm301_vm2 }
  0x21   : > { %514 = vpow2.f32 %v274_v20  ;;  %v464_v27 = vsel %vm311_vm6, 1.0, %v549_v24  ;;  %vm313_vm7 = vmand %vm312_vm3, %vm301_vm2  ;;  %v362_v28 = vadd.f32 %v475_v18, %v463_v25 }
  0x22   : > { %516 = vpow2.f32 %v276_v21  ;;  %v465_v30 = vsel %vm313_vm7, 1.0, %v549_v24  ;;  %vm315_vm8 = vmand %vm314_vm4, %vm301_vm2  ;;  %v363_v31 = vadd.f32 %v476_v19, %v464_v27 }
  0x23   : > { %518 = vpow2.f32 %v278_v22  ;;  %v466_v32 = vsel %vm315_vm8, 1.0, %v549_v24  ;;  %479 = vst [vmem:[%s719_s2 + $0x40] sm:$0xff] %v362_v28  ;;  %v364_v33 = vadd.f32 %v477_v26, %v465_v30 }
  0x24   : > { %520 = vpow2.f32 %v280_v23  ;;  %480 = vst [vmem:[%s719_s2 + $0x48] sm:$0xff] %v363_v31  ;;  %v365_v34 = vadd.f32 %v478_v29, %v466_v32 }
  0x25   : > { %481 = vst [vmem:[%s719_s2 + $0x50] sm:$0xff] %v364_v33 }
  0x26   : > { %482 = vst [vmem:[%s719_s2 + $0x58] sm:$0xff] %v365_v34 }
  0x2b   : > { %v515_v35 = vpop.eup %514 }
  0x2c   : > { %v517_v36 = vpop.eup %516 }
  0x2d   : > { %v519_v37 = vpop.eup %518  ;;  %v282_v38 = vadd.f32 %v517_v36, %v515_v35 }
  0x2e   : > { %v521_v39 = vpop.eup %520 }
  0x2f   : > { %v283_v40 = vadd.f32 %v519_v37, %v282_v38 }
  0x31   : > { %v284_v41 = vadd.f32 %v521_v39, %v283_v40 }
  0x33   : > { %522 = vrcp.f32 %v284_v41 }
  0x3d   : > { %v523_v42 = vpop.eup %522 }
  0x3e   : > { %v287_v43 = vmul.f32 %v523_v42, %v515_v35  ;;  %v288_v44 = vmul.f32 %v523_v42, %v517_v36  ;;  %v289_v45 = vmul.f32 %v523_v42, %v519_v37  ;;  %v290_v46 = vmul.f32 %v523_v42, %v521_v39 }
  0x40   : > { %v304_v50 = vsel %vm301_vm2, %v287_v43, 0.0  ;;  %v305_v51 = vsel %vm301_vm2, %v288_v44, 0.0  ;;  %v306_v52 = vsel %vm301_vm2, %v289_v45, 0.0  ;;  %v307_v53 = vsel %vm301_vm2, %v290_v46, 0.0 }
  0x41   : > { %v328_v56 = vmul.f32 %v463_v25, %v304_v50  ;;  %v329_v57 = vmul.f32 %v464_v27, %v305_v51  ;;  %v330_v58 = vmul.f32 %v465_v30, %v306_v52  ;;  %v331_v59 = vmul.f32 %v466_v32, %v307_v53 }
  0x42   : > { %v345_v63 = vmul.f32 %v304_v50, %v304_v50  ;;  %v346_v0 = vmul.f32 %v305_v51, %v305_v51  ;;  %v347_v1 = vmul.f32 %v306_v52, %v306_v52  ;;  %v348_v2 = vmul.f32 %v307_v53, %v307_v53 }
  0x43   : > { %v332_v3 = vadd.f32 %v328_v56, %v324_v47  ;;  %v333_v4 = vadd.f32 %v329_v57, %v325_v48  ;;  %v334_v5 = vadd.f32 %v330_v58, %v326_v49  ;;  %v335_v6 = vadd.f32 %v331_v59, %v327_v54 }
  0x44   : > { %v349_v7 = vadd.f32 %v467_v55, %v345_v63  ;;  %v350_v8 = vadd.f32 %v468_v60, %v346_v0  ;;  %v351_v9 = vadd.f32 %v469_v61, %v347_v1  ;;  %v352_v10 = vadd.f32 %v470_v62, %v348_v2 }
  0x45   : > { %336 = vst [vmem:[%s719_s2] sm:$0xff] %v332_v3  ;;  %337 = vst [vmem:[%s719_s2 + $0x8] sm:$0xff] %v333_v4 }
  0x46   : > { %338 = vst [vmem:[%s719_s2 + $0x10] sm:$0xff] %v334_v5  ;;  %339 = vst [vmem:[%s719_s2 + $0x18] sm:$0xff] %v335_v6 }
  0x47   : > { %471 = vst [vmem:[%s719_s2 + $0x20] sm:$0xff] %v349_v7  ;;  %472 = vst [vmem:[%s719_s2 + $0x28] sm:$0xff] %v350_v8 }
  0x48   : > { %473 = vst [vmem:[%s719_s2 + $0x30] sm:$0xff] %v351_v9  ;;  %474 = vst [vmem:[%s719_s2 + $0x38] sm:$0xff] %v352_v10 }
  0x49 PF: > { %s12_s11 = sadd.s32 1, %s546_s11   ;;  %s720_s9 = smov %s542_s10 }
  0x4a   : > { %p9_p6 = scmp.ge.s32.totalorder %s12_s11, 4   ;;  %s721_s10 = smov %s723_s12 }
  0x4c   :  { %11 = sbr.rel (!%p9_p6) target bundleno = 2 (0x2), region = 67 }

</bundles_post_ra>
